<compile_context>
chip_gen: v7x
topology: tpu7x:2x2x1
jax: 0.10.0
libtpu: 0.0.40
codegen_flags: <defaults>
</compile_context>

<pallas_src>
import functools

import jax
import jax.numpy as jnp
from jax.experimental import pallas as pl
from jax.experimental.pallas import tpu as pltpu


def _generator_kernel(z_ref, x_ref, w1z_ref, w1x_ref, b1_ref, w2_ref, b2_ref,
                      out_ref):
    """Fused MLP tile: (z@W1z + x@W1x + b1) -> ReLU -> (@W2 + b2).

    z/x/out are (TM, d) batch tiles; weights/biases are full (resident) blocks.
    Both matmuls accumulate in f32 on the MXU; bias add + ReLU run on the f32
    accumulator (cheap on the VPU, no bf16 elementwise needed on v5e).
    """
    h = jnp.dot(z_ref[...], w1z_ref[...], preferred_element_type=jnp.float32)
    h = h + jnp.dot(x_ref[...], w1x_ref[...], preferred_element_type=jnp.float32)
    h = jnp.maximum(h + b1_ref[...], 0.0)                      # bias + ReLU in f32
    o = jnp.dot(h.astype(w2_ref.dtype), w2_ref[...],
                preferred_element_type=jnp.float32)
    out_ref[...] = (o + b2_ref[...]).astype(out_ref.dtype)     # lane-dense store


def generator_forward(z, x, params, *, compute_dtype=None, block_m=2048):
    """JAX wrapper: split W1 (fuses the concat), tile batch, pad output lanes."""
    w1, b1, w2, b2 = params                     # w1: (z_dim+x_dim, 128), w2: (128, theta)
    batch, z_dim = z.shape
    x_dim = x.shape[1]
    hidden = w1.shape[1]
    theta_dim = w2.shape[1]
    out_dtype = z.dtype
    if compute_dtype is None:
        compute_dtype = z.dtype

    # --- Fuse the torch.cat: split W1 into its z- and x- halves. -------------
    w1z = w1[:z_dim, :].astype(compute_dtype)
    w1x = w1[z_dim:, :].astype(compute_dtype)
    z_c = z.astype(compute_dtype)
    x_c = x.astype(compute_dtype)
    w2_c = w2.astype(compute_dtype)
    b1_f = b1.astype(jnp.float32).reshape(1, hidden)
    b2_f = b2.astype(jnp.float32).reshape(1, theta_dim)

    # --- Lane-dense output: pad theta_dim up to a multiple of 128 lanes. -----
    LANE = 128
    theta_pad = max(LANE, ((theta_dim + LANE - 1) // LANE) * LANE)
    if theta_pad != theta_dim:
        w2_c = jnp.pad(w2_c, ((0, 0), (0, theta_pad - theta_dim)))
        b2_f = jnp.pad(b2_f, ((0, 0), (0, theta_pad - theta_dim)))

    # --- Batch tiling (grid over M, multiple of 8 sublanes). ------------------
    SUB = 8
    b_round = ((batch + SUB - 1) // SUB) * SUB          # smallest legal tile
    tm = min(int(block_m), b_round)
    tm = ((tm + SUB - 1) // SUB) * SUB
    b_pad = ((batch + tm - 1) // tm) * tm
    if b_pad != batch:
        pad_rows = b_pad - batch
        z_c = jnp.pad(z_c, ((0, pad_rows), (0, 0)))
        x_c = jnp.pad(x_c, ((0, pad_rows), (0, 0)))
    grid = (b_pad // tm,)

    # --- VMEM footprint -> scoped limit (double-buffered act/out tiles). -----
    cbytes = jnp.dtype(compute_dtype).itemsize
    obytes = jnp.dtype(out_dtype).itemsize
    vmem_bytes = (
        2 * tm * (z_dim + x_dim) * cbytes              # double-buffered z, x tiles
        + 2 * tm * theta_pad * obytes                  # double-buffered out tiles
        + 2 * ((z_dim + x_dim) * hidden + hidden * theta_pad) * cbytes  # weights
        + 2 * (hidden + theta_pad) * 4                 # biases (f32)
        + tm * hidden * 4 + tm * theta_pad * 4         # f32 intermediates
    )
    vmem_limit = min(100 << 20, max(32 << 20, 2 * vmem_bytes))

    cost = pl.CostEstimate(
        flops=2 * b_pad * ((z_dim + x_dim) * hidden + hidden * theta_pad),
        transcendentals=0,
        bytes_accessed=(b_pad * (z_dim + x_dim) * cbytes
                        + b_pad * theta_pad * obytes
                        + ((z_dim + x_dim) * hidden + hidden * theta_pad) * cbytes
                        + (hidden + theta_pad) * 4),
    )

    tile = lambda d: pl.BlockSpec((tm, d), lambda i: (i, 0))      # batch-tiled
    resident = lambda shp: pl.BlockSpec(shp, lambda i: (0, 0))    # stays in VMEM

    out_padded = pl.pallas_call(
        _generator_kernel,
        out_shape=jax.ShapeDtypeStruct((b_pad, theta_pad), out_dtype),
        grid=grid,
        in_specs=[
            tile(z_dim),                       # z
            tile(x_dim),                       # x
            resident((z_dim, hidden)),         # W1z
            resident((x_dim, hidden)),         # W1x
            resident((1, hidden)),             # b1
            resident((hidden, theta_pad)),     # W2 (lane-padded)
            resident((1, theta_pad)),          # b2 (lane-padded)
        ],
        out_specs=tile(theta_pad),
        compiler_params=pltpu.CompilerParams(
            dimension_semantics=("parallel",),
            vmem_limit_bytes=int(vmem_limit),
        ),
        cost_estimate=cost,
    )(z_c, x_c, w1z, w1x, b1_f, w2_c, b2_f)

    return out_padded[:batch, :theta_dim]


def init_generator_params(key, z_dim, x_dim, theta_dim, hidden=128,
                          dtype=jnp.float32):
    """nn.Linear-default init: U(-1/sqrt(fan_in), 1/sqrt(fan_in)).

    Weights stored as (in_features, out_features) — i.e. PyTorch weight^T.
    """
    d_in = z_dim + x_dim
    k1, k2, k3, k4 = jax.random.split(key, 4)
    bound1 = 1.0 / jnp.sqrt(d_in)
    bound2 = 1.0 / jnp.sqrt(hidden)
    w1 = jax.random.uniform(k1, (d_in, hidden), dtype, -bound1, bound1)
    b1 = jax.random.uniform(k2, (1, hidden), dtype, -bound1, bound1)
    w2 = jax.random.uniform(k3, (hidden, theta_dim), dtype, -bound2, bound2)
    b2 = jax.random.uniform(k4, (1, theta_dim), dtype, -bound2, bound2)
    return (w1, b1, w2, b2)


def _reference(z, x, params):
    w1, b1, w2, b2 = params
    zx = jnp.concatenate([z, x], axis=1)
    return jnp.maximum(zx @ w1 + b1, 0.0) @ w2 + b2


if __name__ == "__main__":
    # Small shapes consistent with Generator(z_dim, x_dim, theta_dim).
    batch, z_dim, x_dim, theta_dim = 8, 8, 8, 4

    key = jax.random.PRNGKey(0)
    kz, kx, kp, kz2, kx2 = jax.random.split(key, 5)
    z = jax.random.normal(kz, (batch, z_dim), jnp.float32)
    x = jax.random.normal(kx, (batch, x_dim), jnp.float32)
    params = init_generator_params(kp, z_dim, x_dim, theta_dim)

    # 1) Small batch, single grid step, f32 — tight correctness check.
    out = generator_forward(z, x, params)
    jax.block_until_ready(out)
    ref = _reference(z, x, params)
    assert out.shape == (batch, theta_dim)
    assert jnp.allclose(out, ref, atol=1e-5, rtol=1e-5)

    # 2) Larger, non-multiple batch with a small tile — exercises the batch
    #    grid, row padding and lane-padded output path (still f32).
    big_b = 300
    z2 = jax.random.normal(kz2, (big_b, z_dim), jnp.float32)
    x2 = jax.random.normal(kx2, (big_b, x_dim), jnp.float32)
    out2 = generator_forward(z2, x2, params, block_m=64)
    jax.block_until_ready(out2)
    ref2 = _reference(z2, x2, params)
    assert out2.shape == (big_b, theta_dim)
    assert jnp.allclose(out2, ref2, atol=1e-5, rtol=1e-5)

    # 3) bf16-in / f32-accumulate path (halves HBM traffic on v6e/v7x); loose
    #    tolerance vs the f32 reference.
    out_bf16 = generator_forward(z2, x2, params, compute_dtype=jnp.bfloat16,
                                 block_m=64)
    jax.block_until_ready(out_bf16)
    assert out_bf16.shape == (big_b, theta_dim)
    assert jnp.allclose(out_bf16, ref2, atol=1e-1, rtol=1e-1)

    print("KERNEL_OK")
</pallas_src>

<mosaic_0001>
module attributes {stable_mosaic.version = 11 : i64} {
  func.func @_generator_kernel(%arg0: i32, %arg1: memref<8x8xf32, #tpu.memory_space<vmem>>, %arg2: memref<8x8xf32, #tpu.memory_space<vmem>>, %arg3: memref<8x128xf32, #tpu.memory_space<vmem>>, %arg4: memref<8x128xf32, #tpu.memory_space<vmem>>, %arg5: memref<1x128xf32, #tpu.memory_space<vmem>>, %arg6: memref<128x128xf32, #tpu.memory_space<vmem>>, %arg7: memref<1x128xf32, #tpu.memory_space<vmem>>, %arg8: memref<8x128xf32, #tpu.memory_space<vmem>>) attributes {dimension_semantics = [#tpu.dimension_semantics<parallel>], iteration_bounds = array<i64: 1>, scalar_prefetch = 0 : i64, scratch_operands = 0 : i64, tpu.core_type = #tpu.core_type<tc>, window_params = [{transform_indices = @transform_0, window_bounds = array<i64: 8, 8>}, {transform_indices = @transform_1, window_bounds = array<i64: 8, 8>}, {pipeline_mode = #tpu.pipeline_mode<synchronous>, transform_indices = @transform_2, window_bounds = array<i64: 8, 128>}, {pipeline_mode = #tpu.pipeline_mode<synchronous>, transform_indices = @transform_3, window_bounds = array<i64: 8, 128>}, {pipeline_mode = #tpu.pipeline_mode<synchronous>, transform_indices = @transform_4, window_bounds = array<i64: 1, 128>}, {pipeline_mode = #tpu.pipeline_mode<synchronous>, transform_indices = @transform_5, window_bounds = array<i64: 128, 128>}, {pipeline_mode = #tpu.pipeline_mode<synchronous>, transform_indices = @transform_6, window_bounds = array<i64: 1, 128>}, {transform_indices = @transform_7, window_bounds = array<i64: 8, 128>}]} {
    %c0 = arith.constant 0 : index
    %c0_0 = arith.constant 0 : index
    %0 = vector.load %arg1[%c0, %c0_0] : memref<8x8xf32, #tpu.memory_space<vmem>>, vector<8x8xf32>
    %c0_1 = arith.constant 0 : index
    %c0_2 = arith.constant 0 : index
    %1 = vector.load %arg3[%c0_1, %c0_2] : memref<8x128xf32, #tpu.memory_space<vmem>>, vector<8x128xf32>
    %cst = arith.constant dense<0.000000e+00> : vector<8x128xf32>
    %2 = tpu.matmul %0, %1, %cst {dimension_numbers = #tpu.dot_dimension_numbers<[1], [0], [0], [1], [0, 0, 1, 1], [], []>} : vector<8x8xf32>, vector<8x128xf32>, vector<8x128xf32> -> vector<8x128xf32>
    %c0_3 = arith.constant 0 : index
    %c0_4 = arith.constant 0 : index
    %3 = vector.load %arg2[%c0_3, %c0_4] : memref<8x8xf32, #tpu.memory_space<vmem>>, vector<8x8xf32>
    %c0_5 = arith.constant 0 : index
    %c0_6 = arith.constant 0 : index
    %4 = vector.load %arg4[%c0_5, %c0_6] : memref<8x128xf32, #tpu.memory_space<vmem>>, vector<8x128xf32>
    %cst_7 = arith.constant dense<0.000000e+00> : vector<8x128xf32>
    %5 = tpu.matmul %3, %4, %cst_7 {dimension_numbers = #tpu.dot_dimension_numbers<[1], [0], [0], [1], [0, 0, 1, 1], [], []>} : vector<8x8xf32>, vector<8x128xf32>, vector<8x128xf32> -> vector<8x128xf32>
    %6 = arith.addf %2, %5 : vector<8x128xf32>
    %c0_8 = arith.constant 0 : index
    %c0_9 = arith.constant 0 : index
    %7 = vector.load %arg5[%c0_8, %c0_9] : memref<1x128xf32, #tpu.memory_space<vmem>>, vector<1x128xf32>
    %8 = vector.broadcast %7 : vector<1x128xf32> to vector<8x128xf32>
    %9 = arith.addf %6, %8 : vector<8x128xf32>
    %cst_10 = arith.constant 0.000000e+00 : f32
    %10 = vector.broadcast %cst_10 : f32 to vector<8x128xf32>
    %11 = arith.maximumf %9, %10 : vector<8x128xf32>
    %c0_11 = arith.constant 0 : index
    %c0_12 = arith.constant 0 : index
    %12 = vector.load %arg6[%c0_11, %c0_12] : memref<128x128xf32, #tpu.memory_space<vmem>>, vector<128x128xf32>
    %cst_13 = arith.constant dense<0.000000e+00> : vector<8x128xf32>
    %13 = tpu.matmul %11, %12, %cst_13 {dimension_numbers = #tpu.dot_dimension_numbers<[1], [0], [0], [1], [0, 0, 1, 1], [], []>} : vector<8x128xf32>, vector<128x128xf32>, vector<8x128xf32> -> vector<8x128xf32>
    %c0_14 = arith.constant 0 : index
    %c0_15 = arith.constant 0 : index
    %14 = vector.load %arg7[%c0_14, %c0_15] : memref<1x128xf32, #tpu.memory_space<vmem>>, vector<1x128xf32>
    %15 = vector.broadcast %14 : vector<1x128xf32> to vector<8x128xf32>
    %16 = arith.addf %13, %15 : vector<8x128xf32>
    %c0_16 = arith.constant 0 : index
    %c0_17 = arith.constant 0 : index
    %17 = vector.load %arg8[%c0_16, %c0_17] : memref<8x128xf32, #tpu.memory_space<vmem>>, vector<8x128xf32>
    tpu.vector_store %arg8[%c0_16, %c0_17], %16 {strides = array<i32>} : memref<8x128xf32, #tpu.memory_space<vmem>>, vector<8x128xf32>,
    return
  }
  func.func @transform_0(%arg0: i32) -> (i32, i32) {
    %c0_i32 = arith.constant 0 : i32
    %c0_i32_0 = arith.constant 0 : i32
    return %arg0, %c0_i32 : i32, i32
  }
  func.func @transform_1(%arg0: i32) -> (i32, i32) {
    %c0_i32 = arith.constant 0 : i32
    %c0_i32_0 = arith.constant 0 : i32
    return %arg0, %c0_i32 : i32, i32
  }
  func.func @transform_2(%arg0: i32) -> (i32, i32) {
    %c0_i32 = arith.constant 0 : i32
    %c0_i32_0 = arith.constant 0 : i32
    %c0_i32_1 = arith.constant 0 : i32
    return %c0_i32, %c0_i32_0 : i32, i32
  }
  func.func @transform_3(%arg0: i32) -> (i32, i32) {
    %c0_i32 = arith.constant 0 : i32
    %c0_i32_0 = arith.constant 0 : i32
    %c0_i32_1 = arith.constant 0 : i32
    return %c0_i32, %c0_i32_0 : i32, i32
  }
  func.func @transform_4(%arg0: i32) -> (i32, i32) {
    %c0_i32 = arith.constant 0 : i32
    %c0_i32_0 = arith.constant 0 : i32
    %c0_i32_1 = arith.constant 0 : i32
    return %c0_i32, %c0_i32_0 : i32, i32
  }
  func.func @transform_5(%arg0: i32) -> (i32, i32) {
    %c0_i32 = arith.constant 0 : i32
    %c0_i32_0 = arith.constant 0 : i32
    %c0_i32_1 = arith.constant 0 : i32
    return %c0_i32, %c0_i32_0 : i32, i32
  }
  func.func @transform_6(%arg0: i32) -> (i32, i32) {
    %c0_i32 = arith.constant 0 : i32
    %c0_i32_0 = arith.constant 0 : i32
    %c0_i32_1 = arith.constant 0 : i32
    return %c0_i32, %c0_i32_0 : i32, i32
  }
  func.func @transform_7(%arg0: i32) -> (i32, i32) {
    %c0_i32 = arith.constant 0 : i32
    %c0_i32_0 = arith.constant 0 : i32
    return %arg0, %c0_i32 : i32, i32
  }
}

</mosaic_0001>

<bundles_post_ra>
// kernel: tpu_custom_call.1
= control target key start
LH: loop header
LB: loop body
LE: loop exit
PB: predicated region body
PF: predicated region fallthrough
CT: control target
= control target key end

     0   :  { %12 = vsyncpa [#allocation3], 0  ;;  %s700_s0 = inlined_call_operand.hbm [shape: f32[8,8], index: 0, kind: input, shape index: {}]   ;;  %s701_s1 = inlined_call_operand.hbm [shape: f32[8,8], index: 1, kind: input, shape index: {}]   ;;  %s702_s2 = inlined_call_operand.hbm [shape: f32[8,128], index: 2, kind: input, shape index: {}]   ;;  %s703_s3 = inlined_call_operand.vmem [shape: f32[8,128], index: 3, kind: input, shape index: {}]   ;;  %s704_s4 = inlined_call_operand.vmem [shape: f32[1,128], index: 4, kind: input, shape index: {}]   ;;  %s705_s5 = inlined_call_operand.hbm [shape: f32[128,128], index: 5, kind: input, shape index: {}]   ;;  %s706_s6 = inlined_call_operand.vmem [shape: f32[1,128], index: 6, kind: input, shape index: {}]   ;;  %s707_s7 = inlined_call_operand.hbm [shape: f32[8,128], index: 7, kind: output, shape index: {}]  }
   0x1   :  { %13 = vsyncpa [#allocation6], 0 }
   0x2   :  { %14 = vsyncpa [#allocation9], 0 }
   0x3   :  { %15 = vsyncpa [#allocation4], 0  ;;  %s569_s24 = smov [#allocation5]   ;;  %s570_s26 = smov [#allocation2]  }
   0x4   :  { %s32_s25 = sshll.u32 %s569_s24, 4  ;;  %s22_s27 = sshll.u32 %s570_s26, 4  ;;  %s33_s25 = int_to_ptr.vmem [resolvable:$true] %s32_s25  ;;  %s23_s27 = int_to_ptr.vmem [resolvable:$true] %s22_s27 }
   0x5   :  { %s451_s30 = scalar_lea.hbm %s701_s1, 128 }
   0x6   :  { %p452_p0 = scmp.ne.s32.totalorder %s701_s1, %s451_s30  ;;  %p455_p1 = scmp.lt.u32.totalorder %s451_s30, %s701_s1 }
   0x8   :  { %p457_p2 = pnand %p455_p1, %p452_p0 }
   0xa   :  { %460 = shalt.err (!%p457_p2)
}
   0xb   :  { %s461_s12 = scalar_lea.vmem %s33_s25, 128  ;;  %p466_p4 = scmp.lt.s32.totalorder %s33_s25, %s33_s25 }
   0xc   :  { %p462_p3 = scmp.ne.s32.totalorder %s33_s25, %s461_s12  ;;  %p467_p5 = scmp.lt.s32.totalorder %s461_s12, %s461_s12 }
   0xe   :  { %p468_p6 = por %p467_p5, %p466_p4 }
  0x10   :  { %p469_p7 = pnand %p468_p6, %p462_p3 }
  0x12   :  { %472 = shalt.err (!%p469_p7)
}
  0x13   :  { %35 = dma.hbm_to_vmem [thread:$0]  %s701_s1, 128, %s33_s25, [#allocation6]  }
  0x14   :  { %s473_s17 = scalar_lea.hbm %s700_s0, 128 }
  0x15   :  { %p474_p8 = scmp.ne.s32.totalorder %s700_s0, %s473_s17  ;;  %p477_p9 = scmp.lt.u32.totalorder %s473_s17, %s700_s0 }
  0x17   :  { %p479_p10 = pnand %p477_p9, %p474_p8 }
  0x19   :  { %482 = shalt.err (!%p479_p10)
}
  0x1a   :  { %s483_s22 = scalar_lea.vmem %s23_s27, 128  ;;  %p488_p12 = scmp.lt.s32.totalorder %s23_s27, %s23_s27 }
  0x1b   :  { %p484_p11 = scmp.ne.s32.totalorder %s23_s27, %s483_s22  ;;  %p489_p13 = scmp.lt.s32.totalorder %s483_s22, %s483_s22 }
  0x1d   :  { %p490_p0 = por %p489_p13, %p488_p12 }
  0x1f   :  { %p491_p1 = pnand %p490_p0, %p484_p11 }
  0x21   :  { %494 = shalt.err (!%p491_p1)
}
  0x22   :  { %25 = dma.hbm_to_vmem [thread:$0]  %s700_s0, 128, %s23_s27, [#allocation3]  }
  0x23   :  { %s571_s24 = smov [#allocation7]   ;;  %s572_s26 = smov [#allocation8]  }
  0x24   :  { %s42_s25 = sshll.u32 %s571_s24, 4  ;;  %s55_s28 = sshll.u32 %s572_s26, 4  ;;  %s43_s25 = int_to_ptr.vmem [resolvable:$true] %s42_s25  ;;  %s643_s28 = int_to_ptr.vmem [resolvable:$true] %s55_s28 }
  0x25   :  { %s495_s8 = scalar_lea.hbm %s702_s2, 128 }
  0x26   :  { %p496_p2 = scmp.ne.s32.totalorder %s702_s2, %s495_s8  ;;  %p499_p3 = scmp.lt.u32.totalorder %s495_s8, %s702_s2 }
  0x28   :  { %p501_p4 = pnand %p499_p3, %p496_p2 }
  0x2a   :  { %504 = shalt.err (!%p501_p4)
}
  0x2b   :  { %s505_s0 = scalar_lea.vmem %s43_s25, 128  ;;  %p510_p6 = scmp.lt.s32.totalorder %s43_s25, %s43_s25 }
  0x2c   :  { %p506_p5 = scmp.ne.s32.totalorder %s43_s25, %s505_s0  ;;  %p511_p7 = scmp.lt.s32.totalorder %s505_s0, %s505_s0 }
  0x2e   :  { %p512_p8 = por %p511_p7, %p510_p6 }
  0x30   :  { %p513_p9 = pnand %p512_p8, %p506_p5 }
  0x32   :  { %516 = shalt.err (!%p513_p9)
}
  0x33   :  { %45 = dma.hbm_to_vmem [thread:$0]  %s702_s2, 128, %s43_s25, [#allocation6]  }
  0x34   :  { %s517_s16 = scalar_lea.hbm %s705_s5, 2048 }
  0x35   :  { %p518_p10 = scmp.ne.s32.totalorder %s705_s5, %s517_s16  ;;  %p521_p11 = scmp.lt.u32.totalorder %s517_s16, %s705_s5 }
  0x37   :  { %p523_p12 = pnand %p521_p11, %p518_p10 }
  0x39   :  { %526 = shalt.err (!%p523_p12)
}
  0x3a   :  { %s527_s21 = scalar_lea.vmem %s643_s28, 2048  ;;  %p532_p0 = scmp.lt.s32.totalorder %s643_s28, %s643_s28 }
  0x3b   :  { %p528_p13 = scmp.ne.s32.totalorder %s643_s28, %s527_s21  ;;  %p533_p1 = scmp.lt.s32.totalorder %s527_s21, %s527_s21 }
  0x3d   :  { %p534_p2 = por %p533_p1, %p532_p0 }
  0x3f   :  { %p535_p3 = pnand %p534_p2, %p528_p13 }
  0x41   :  { %538 = shalt.err (!%p535_p3)
}
  0x42   :  { %s573_s2 = smov 128   ;;  %s574_s22 = smov 8  }
  0x43   :  { %61 = dma.hbm_to_vmem [thread:$0]  %s705_s5, 2048, %s643_s28, [#allocation9], %s573_s2, %s573_s2, %s574_s22  }
  0x44   :  { %561 = dma.done.wait [#allocation3], 128  }
  0x45   :  { %562 = vsyncadd [#allocation3], 4294967168 }
  0x46   :  { %563 = dma.done.wait [#allocation6], 256  }
  0x47   :  { %564 = vsyncadd [#allocation6], 4294967040 }
  0x48   :  { %565 = dma.done.wait [#allocation9], 2048  }
  0x49   :  { %566 = vsyncadd [#allocation9], 4294965248  ;;  %v575_v0 = vmov 0.0   ;;  %vm576_vm0 = vmmov 0   ;;  %v577_v1 = vmov 0.0|0.0   ;;  %vm80_vm1 = vcmask 64512  }
  0x4a   :  { %372 = vmatprep.subr.mxu1 %v575_v0  ;;  %374 = vmatprep.mubr.msk.f32.mxu1 %vm576_vm0, %v575_v0  ;;  %v79_v2 = vld [vmem:[%s703_s3] sm:$0xff]  ;;  %v78_v3 = vld [vmem:[#allocation5] sm:$0xff]  ;;  %v77_v4 = vld [vmem:[#allocation7] sm:$0xff]  ;;  %s578_s29 = smov [#allocation10]  }
  0x4b   :  { %417 = vmatprep.subr.bf16.mxu0 %v577_v1  ;;  %414 = vmatprep.mubr.msk.f32.mxu0 %vm576_vm0, %v575_v0  ;;  %v236_v5 = vld [vmem:[#allocation8] sm:$0xff]  ;;  %v237_v6 = vld [vmem:[#allocation8 + $0x8] sm:$0xff]  ;;  %v238_v8 = vld [vmem:[#allocation8 + $0x10] sm:$0xff]  ;;  %s336_s30 = sshll.u32 %s578_s29, 4  ;;  %s337_s30 = int_to_ptr.vmem [resolvable:$true] %s336_s30 }
  0x4c   :  { %373 = vmatpush3.msra.mxu1 %v79_v2  ;;  %v418_v7 = vpack.c.bf16 %v237_v6, %v236_v5  ;;  %v239_v9 = vld [vmem:[#allocation8 + $0x18] sm:$0xff]  ;;  %v76_v10 = vld [vmem:[#allocation2] sm:$0xff]  ;;  %v240_v12 = vld [vmem:[#allocation8 + $0x20] sm:$0xff]  ;;  %s539_s8 = scalar_lea.vmem %s337_s30, 128  ;;  %p544_p5 = scmp.lt.s32.totalorder %s337_s30, %s337_s30 }
  0x4d   :  { %375 = vmatmul.mubr.msk.f32.vlgmr.msra.gmra.mrb[0].mxu1 %vm80_vm1, %v78_v3  ;;  %377 = vmatprep.subr.mxu1 %v575_v0  ;;  %v421_v11 = vpack.c.bf16 %v239_v9, %v238_v8  ;;  %v241_v13 = vld [vmem:[#allocation8 + $0x28] sm:$0xff]  ;;  %v242_v15 = vld [vmem:[#allocation8 + $0x30] sm:$0xff]  ;;  %v243_v16 = vld [vmem:[#allocation8 + $0x38] sm:$0xff]  ;;  %p540_p4 = scmp.ne.s32.totalorder %s337_s30, %s539_s8  ;;  %p545_p6 = scmp.lt.s32.totalorder %s539_s8, %s539_s8 }
  0x4e   :  { %378 = vmatpush3.msra.mxu1 %v77_v4  ;;  %379 = vmatprep.mubr.msk.f32.mxu1 %vm576_vm0, %v575_v0  ;;  %v424_v14 = vpack.c.bf16 %v241_v13, %v240_v12  ;;  %v427_v17 = vpack.c.bf16 %v243_v16, %v242_v15  ;;  %v244_v18 = vld [vmem:[#allocation8 + $0x40] sm:$0xff]  ;;  %v245_v19 = vld [vmem:[#allocation8 + $0x48] sm:$0xff]  ;;  %v246_v21 = vld [vmem:[#allocation8 + $0x50] sm:$0xff] }
  0x4f   :  { %419 = vmatpush3.bf16.msra.mxu0 %v418_v7  ;;  %v430_v20 = vpack.c.bf16 %v245_v19, %v244_v18  ;;  %v247_v22 = vld [vmem:[#allocation8 + $0x58] sm:$0xff]  ;;  %v248_v24 = vld [vmem:[#allocation8 + $0x60] sm:$0xff]  ;;  %v249_v25 = vld [vmem:[#allocation8 + $0x68] sm:$0xff]  ;;  %p546_p7 = por %p545_p6, %p544_p5 }
  0x50   :  { %420 = vmatprep.subr.bf16.mxu0 %v577_v1  ;;  %v433_v23 = vpack.c.bf16 %v247_v22, %v246_v21  ;;  %v436_v26 = vpack.c.bf16 %v249_v25, %v248_v24  ;;  %v250_v27 = vld [vmem:[#allocation8 + $0x70] sm:$0xff]  ;;  %v251_v28 = vld [vmem:[#allocation8 + $0x78] sm:$0xff]  ;;  %v349_v33 = vld [vmem:[%s704_s4] ss:$0 sm:$0xff] }
  0x51   :  { %380 = vmatmul.mubr.msk.f32.vlgmr.msra.gmra.mrb[2].mxu1 %vm80_vm1, %v76_v10  ;;  %v439_v29 = vpack.c.bf16 %v251_v28, %v250_v27  ;;  %v350_v38 = vld [vmem:[%s706_s6] ss:$0 sm:$0xff]  ;;  %p547_p8 = pnand %p546_p7, %p540_p4 }
  0x53   :  { %422 = vmatpush3.bf16.msra.mxu0 %v421_v11 }
  0x54   :  { %423 = vmatprep.subr.bf16.mxu0 %v577_v1 }
  0x57   :  { %425 = vmatpush3.bf16.msra.mxu0 %v424_v14 }
  0x58   :  { %426 = vmatprep.subr.bf16.mxu0 %v577_v1 }
  0x5b   :  { %428 = vmatpush3.bf16.msra.mxu0 %v427_v17 }
  0x5c   :  { %429 = vmatprep.subr.bf16.mxu0 %v577_v1 }
  0x5f   :  { %431 = vmatpush3.bf16.msra.mxu0 %v430_v20 }
  0x60   :  { %432 = vmatprep.subr.bf16.mxu0 %v577_v1 }
  0x63   :  { %434 = vmatpush3.bf16.msra.mxu0 %v433_v23 }
  0x64   :  { %435 = vmatprep.subr.bf16.mxu0 %v577_v1 }
  0x67   :  { %437 = vmatpush3.bf16.msra.mxu0 %v436_v26 }
  0x68   :  { %438 = vmatprep.subr.bf16.mxu0 %v577_v1 }
  0x6b   :  { %440 = vmatpush3.bf16.msra.mxu0 %v439_v29 }
 0x120   :  { %v150_v30 = vpop.f32.mrb[0].mxu1 }
 0x121   :  { %v376_v31 = vpop.f32.mrb[1].mxu1 }
 0x124   :  { %v223_v32 = vpop.f32.mrb[2].mxu1 }
 0x125   :  { %v224_v34 = vadd.f32 %v223_v32, %v150_v30  ;;  %v381_v35 = vpop.f32.mrb[3].mxu1 }
 0x127   :  { %v234_v36 = vadd.f32 %v349_v33, %v224_v34 }
 0x129   :  { %v235_v37 = vmax.f32 %v234_v36, 0.0 }
 0x12b   :  { %415 = vmatmul.mubr.f32.vlgmr.msra.gmra.mrb[0].mxu0 %v235_v37 }
 0x1fe   :  { %v325_v39 = vpop.f32.mrb[0].mxu0 }
 0x1ff   :  { %v326_v40 = vadd.f32 %v350_v38, %v325_v39  ;;  %v416_v41 = vpop.f32.mrb[1].mxu0 }
 0x201   :  { %329 = vst [vmem:[#allocation10] sm:$0xff] %v326_v40 }
 0x202   :  { %550 = shalt.err (!%p547_p8)
}
 0x203   :  { %s551_s10 = scalar_lea.hbm %s707_s7, 128 }
 0x204   :  { %p552_p9 = scmp.ne.s32.totalorder %s707_s7, %s551_s10  ;;  %p555_p10 = scmp.lt.u32.totalorder %s551_s10, %s707_s7 }
 0x206   :  { %p557_p11 = pnand %p555_p10, %p552_p9 }
 0x208   :  { %560 = shalt.err (!%p557_p11)
}
 0x209   :  { %339 = dma.vmem_to_hbm [thread:$0]  %s337_s30, 128, %s707_s7, [#allocation4]  }
 0x20a   :  { %567 = dma.done.wait [#allocation4], 128  }
 0x20b   :  { %568 = vsyncadd [#allocation4], 4294967168 }
 0x20c   :  { %343 = vsyncpa [#allocation3], 1 }
 0x20d   :  { %344 = vsyncpa [#allocation6], 1 }
 0x20e   :  { %345 = vsyncpa [#allocation9], 1 }
 0x20f   :  { %346 = vsyncpa [#allocation4], 1 }

</bundles_post_ra>
